<compile_context>
chip_gen: v5e
topology: v5e:2x2
jax: 0.10.0
libtpu: 0.0.40
codegen_flags: <defaults>
</compile_context>

<pallas_src>
import functools

import jax
import jax.numpy as jnp
from jax.experimental import pallas as pl
from jax.experimental.pallas import tpu as pltpu


def _round_up(x, m):
    return (x + m - 1) // m * m


# ----------------------------------------------------------------------------
# Kernel 1: branch MLPs + merge (tiny, grid-less, f32, VMEM resident)
# ----------------------------------------------------------------------------

def _branch_merge_kernel(*refs, num_branches, branch_nlayers, merge_type):
    it = iter(refs)
    x_refs = [next(it) for _ in range(num_branches)]
    layer_refs = []
    for nl in branch_nlayers:
        layer_refs.append([(next(it), next(it)) for _ in range(nl)])
    o_ref = next(it)

    combined = None
    for bi in range(num_branches):
        x = x_refs[bi][...]                                     # (B_pad, d_in)
        n = len(layer_refs[bi])
        for li, (w_ref, b_ref) in enumerate(layer_refs[bi]):
            x = jnp.dot(x, w_ref[...], preferred_element_type=jnp.float32)
            x = x + b_ref[...]                                  # (1, d_out)
            if li < n - 1:
                x = jnp.maximum(x, 0.0)
        if combined is None:
            combined = x
        elif merge_type == 'mul':
            combined = combined * x
        else:                                                   # 'sum'
            combined = combined + x
    o_ref[...] = combined                                       # (B_pad, H)


# ----------------------------------------------------------------------------
# Kernel 2: trunk MLP + contraction + bias, transposed & row-tiled
#   grid = (batch, P_pad // TILE); every matmul is W_t (M, K) @ act (K, TILE)
# ----------------------------------------------------------------------------

def _trunk_contract_kernel(*refs, n_layers):
    it = iter(refs)
    x_ref = next(it)                                            # (1, D, TILE) bf16
    layers = [(next(it), next(it)) for _ in range(n_layers)]    # Wt bf16, bt f32
    wc_ref = next(it)                                           # (1, O_pad, H*O) bf16
    bias_ref = next(it)                                         # (O_pad, 1) f32
    o_ref = next(it)                                            # (1, O_pad, TILE) f32

    x = x_ref[0]                                                # (D, TILE) bf16
    for li, (w_ref, b_ref) in enumerate(layers):
        # y_t = W^T @ x_t  on the MXU (bf16 in, f32 acc); bias + ReLU in f32.
        y = jnp.dot(w_ref[...], x, preferred_element_type=jnp.float32)
        y = y + b_ref[...]                                      # (d_out, 1) lane-bcast
        if li < n_layers - 1:
            y = jnp.maximum(y, 0.0)
        x = y.astype(jnp.bfloat16)                              # next MXU input

    # Contraction as ONE MXU matmul with the per-batch block-diagonal operand:
    # out_t[o, p] = sum_j Wc[o, j] * trunk_t[j, p]  ->  (O_pad, TILE), lane-dense.
    out = jnp.dot(wc_ref[0], x, preferred_element_type=jnp.float32)
    o_ref[0] = out + bias_ref[...]


# ----------------------------------------------------------------------------
# Wrapper: layout plumbing in plain JAX, hot path in the gridded pallas_call
# ----------------------------------------------------------------------------

def mimonet_forward_pallas(params, branch_inputs, trunk_input,
                           hidden_dim, num_outputs, merge_type='mul'):
    assert merge_type in ('mul', 'sum')
    branch_params, trunk_params, bias = params
    num_branches = len(branch_params)

    batch = branch_inputs[0].shape[0]
    b2, npts, d_trunk = trunk_input.shape
    assert b2 == batch
    H, O = hidden_dim, num_outputs
    HO = H * O

    # ---------------- 1) branch nets + merge (one tiny Pallas call) ----------
    b_rows = _round_up(batch, 8)
    bargs = [jnp.pad(x.astype(jnp.float32), ((0, b_rows - batch), (0, 0)))
             for x in branch_inputs]
    branch_nlayers = []
    for bp in branch_params:
        branch_nlayers.append(len(bp))
        for (w, b) in bp:
            bargs.append(w.astype(jnp.float32))
            bargs.append(b.reshape(1, -1).astype(jnp.float32))

    branch_kernel = functools.partial(
        _branch_merge_kernel, num_branches=num_branches,
        branch_nlayers=tuple(branch_nlayers), merge_type=merge_type)

    combined = pl.pallas_call(
        branch_kernel,
        out_shape=jax.ShapeDtypeStruct((b_rows, H), jnp.float32),
        in_specs=[pl.BlockSpec(memory_space=pltpu.MemorySpace.VMEM)] * len(bargs),
        out_specs=pl.BlockSpec(memory_space=pltpu.MemorySpace.VMEM),
    )(*bargs)[:batch]                                           # (B, H) f32

    # ---------------- 2) per-batch contraction operand (layout prep) ---------
    # Wc[b, o, j] = combined[b, j // O] * (j % O == o)  -> block-diagonal so the
    # whole einsum('bi,bpio->bpo') becomes one MXU matmul per tile.
    O_pad = _round_up(O, 8)
    j = jnp.arange(HO)
    mask_t = (j[None, :] % O == jnp.arange(O)[:, None]).astype(jnp.float32)  # (O, HO)
    ct = jnp.repeat(combined, O, axis=1)                                      # (B, HO)
    wc = (ct[:, None, :] * mask_t[None]).astype(jnp.bfloat16)                 # (B, O, HO)
    wc = jnp.pad(wc, ((0, 0), (0, O_pad - O), (0, 0)))                        # (B, O_pad, HO)

    # ---------------- 3) trunk MLP + contraction (gridded, transposed) -------
    TILE = min(512, _round_up(npts, 128))      # lane-dim tile; sweep 256-1024
    P_pad = _round_up(npts, TILE)              # per-batch padded -> tiles stay aligned

    x_t = jnp.swapaxes(trunk_input, 1, 2).astype(jnp.bfloat16)                # (B, D, P)
    x_t = jnp.pad(x_t, ((0, 0), (0, 0), (0, P_pad - npts)))                   # (B, D, P_pad)

    targs = [x_t]
    t_specs = [pl.BlockSpec((1, d_trunk, TILE), lambda b, r: (b, 0, r))]
    for (w, bvec) in trunk_params:
        wt = jnp.transpose(w).astype(jnp.bfloat16)                            # (d_out, d_in)
        bt = bvec.reshape(-1, 1).astype(jnp.float32)                          # (d_out, 1)
        targs.append(wt)
        t_specs.append(pl.BlockSpec(wt.shape, lambda b, r: (0, 0)))           # resident
        targs.append(bt)
        t_specs.append(pl.BlockSpec(bt.shape, lambda b, r: (0, 0)))           # resident
    targs.append(wc)
    t_specs.append(pl.BlockSpec((1, O_pad, HO), lambda b, r: (b, 0, 0)))
    bias_t = jnp.pad(bias.reshape(O, 1).astype(jnp.float32), ((0, O_pad - O), (0, 0)))
    targs.append(bias_t)
    t_specs.append(pl.BlockSpec((O_pad, 1), lambda b, r: (0, 0)))

    trunk_kernel = functools.partial(_trunk_contract_kernel, n_layers=len(trunk_params))
    # TODO(synk): biases could be packed into one (max_dout, n_layers) array to
    # drop a couple of micro-DMAs; left separate for clarity (negligible cost).

    out_t = pl.pallas_call(
        trunk_kernel,
        out_shape=jax.ShapeDtypeStruct((batch, O_pad, P_pad), jnp.float32),
        grid=(batch, P_pad // TILE),
        in_specs=t_specs,
        out_specs=pl.BlockSpec((1, O_pad, TILE), lambda b, r: (b, 0, r)),
        compiler_params=pltpu.CompilerParams(
            dimension_semantics=(pltpu.PARALLEL, pltpu.PARALLEL),
            vmem_limit_bytes=32 * 1024 * 1024),
    )(*targs)

    # ---------------- 4) un-plumb: slice padding, transpose back -------------
    return jnp.swapaxes(out_t[:, :O, :npts], 1, 2)              # (B, P, O)


# ----------------------------------------------------------------------------
# Pure-JAX reference (mirrors the PyTorch forward) + deterministic init
# ----------------------------------------------------------------------------

def init_fcn(key, arch):
    """Deterministic FCN params: list of (W, b) with W: (in, out)."""
    params = []
    for d_in, d_out in zip(arch[:-1], arch[1:]):
        key, kw, kb = jax.random.split(key, 3)
        scale = 1.0 / jnp.sqrt(jnp.float32(d_in))
        w = jax.random.uniform(kw, (d_in, d_out), jnp.float32, -scale, scale)
        b = jax.random.uniform(kb, (d_out,), jnp.float32, -scale, scale)
        params.append((w, b))
    return params, key


def _fcn_ref(params, x):
    n = len(params)
    for li, (w, b) in enumerate(params):
        x = x @ w + b
        if li < n - 1:
            x = jnp.maximum(x, 0.0)
    return x


def mimonet_forward_ref(params, branch_inputs, trunk_input,
                        hidden_dim, num_outputs, merge_type='mul'):
    branch_params, trunk_params, bias = params
    branch_outs = [_fcn_ref(bp, bi) for bp, bi in zip(branch_params, branch_inputs)]
    combined = branch_outs[0]
    for y in branch_outs[1:]:
        combined = combined * y if merge_type == 'mul' else combined + y
    B, P, D = trunk_input.shape
    trunk_out = _fcn_ref(trunk_params, trunk_input.reshape(B * P, D))
    trunk4 = trunk_out.reshape(B, P, hidden_dim, num_outputs)
    return jnp.einsum('bi,bpio->bpo', combined, trunk4) + bias


# ----------------------------------------------------------------------------
# Main
# ----------------------------------------------------------------------------

if __name__ == "__main__":
    key = jax.random.PRNGKey(0)

    batch = 2
    num_trunk_points = 8
    num_outputs = 2
    hidden_dim = 32
    branch_arch_list = [[4, 32, hidden_dim], [4, 32, hidden_dim]]
    trunk_arch = [3, 32, hidden_dim * num_outputs]   # trunk_arch[-1] = H*O (as in __init__)
    merge_type = 'mul'

    # Deterministic parameter init.
    branch_params = []
    for arch in branch_arch_list:
        p, key = init_fcn(key, arch)
        branch_params.append(p)
    trunk_params, key = init_fcn(key, trunk_arch)
    bias = jnp.zeros((1, 1, num_outputs), jnp.float32)
    params = (branch_params, trunk_params, bias)

    # Deterministic inputs.
    key, k1, k2, k3 = jax.random.split(key, 4)
    branch_inputs = [
        jax.random.normal(k1, (batch, branch_arch_list[0][0]), jnp.float32),
        jax.random.normal(k2, (batch, branch_arch_list[1][0]), jnp.float32),
    ]
    trunk_input = jax.random.normal(
        k3, (batch, num_trunk_points, trunk_arch[0]), jnp.float32)

    out = mimonet_forward_pallas(params, branch_inputs, trunk_input,
                                 hidden_dim, num_outputs, merge_type)
    out = jax.block_until_ready(out)

    ref = mimonet_forward_ref(params, branch_inputs, trunk_input,
                              hidden_dim, num_outputs, merge_type)
    ref = jax.block_until_ready(ref)

    assert out.shape == (batch, num_trunk_points, num_outputs)
    # Tolerance loosened vs the f32 reference because trunk matmuls use bf16
    # MXU inputs (f32 accumulation / epilogues).
    assert jnp.allclose(out, ref, atol=2e-2, rtol=2e-2), "mismatch vs reference"

    print("KERNEL_OK")
</pallas_src>

<mosaic_0001>
module attributes {stable_mosaic.version = 11 : i64} {
  func.func @_branch_merge_kernel(%arg0: memref<8x4xf32, #tpu.memory_space<vmem>>, %arg1: memref<8x4xf32, #tpu.memory_space<vmem>>, %arg2: memref<4x32xf32, #tpu.memory_space<vmem>>, %arg3: memref<1x32xf32, #tpu.memory_space<vmem>>, %arg4: memref<32x32xf32, #tpu.memory_space<vmem>>, %arg5: memref<1x32xf32, #tpu.memory_space<vmem>>, %arg6: memref<4x32xf32, #tpu.memory_space<vmem>>, %arg7: memref<1x32xf32, #tpu.memory_space<vmem>>, %arg8: memref<32x32xf32, #tpu.memory_space<vmem>>, %arg9: memref<1x32xf32, #tpu.memory_space<vmem>>, %arg10: memref<8x32xf32, #tpu.memory_space<vmem>>) attributes {dimension_semantics = [], scalar_prefetch = 0 : i64, scratch_operands = 0 : i64, tpu.core_type = #tpu.core_type<tc>} {
    %c0 = arith.constant 0 : index
    %c0_0 = arith.constant 0 : index
    %0 = vector.load %arg0[%c0, %c0_0] : memref<8x4xf32, #tpu.memory_space<vmem>>, vector<8x4xf32>
    %c0_1 = arith.constant 0 : index
    %c0_2 = arith.constant 0 : index
    %1 = vector.load %arg2[%c0_1, %c0_2] : memref<4x32xf32, #tpu.memory_space<vmem>>, vector<4x32xf32>
    %cst = arith.constant dense<0.000000e+00> : vector<8x32xf32>
    %2 = tpu.matmul %0, %1, %cst {dimension_numbers = #tpu.dot_dimension_numbers<[1], [0], [0], [1], [0, 0, 1, 1], [], []>} : vector<8x4xf32>, vector<4x32xf32>, vector<8x32xf32> -> vector<8x32xf32>
    %c0_3 = arith.constant 0 : index
    %c0_4 = arith.constant 0 : index
    %3 = vector.load %arg3[%c0_3, %c0_4] : memref<1x32xf32, #tpu.memory_space<vmem>>, vector<1x32xf32>
    %4 = vector.broadcast %3 : vector<1x32xf32> to vector<8x32xf32>
    %5 = arith.addf %2, %4 : vector<8x32xf32>
    %cst_5 = arith.constant 0.000000e+00 : f32
    %6 = vector.broadcast %cst_5 : f32 to vector<8x32xf32>
    %7 = arith.maximumf %5, %6 : vector<8x32xf32>
    %c0_6 = arith.constant 0 : index
    %c0_7 = arith.constant 0 : index
    %8 = vector.load %arg4[%c0_6, %c0_7] : memref<32x32xf32, #tpu.memory_space<vmem>>, vector<32x32xf32>
    %cst_8 = arith.constant dense<0.000000e+00> : vector<8x32xf32>
    %9 = tpu.matmul %7, %8, %cst_8 {dimension_numbers = #tpu.dot_dimension_numbers<[1], [0], [0], [1], [0, 0, 1, 1], [], []>} : vector<8x32xf32>, vector<32x32xf32>, vector<8x32xf32> -> vector<8x32xf32>
    %c0_9 = arith.constant 0 : index
    %c0_10 = arith.constant 0 : index
    %10 = vector.load %arg5[%c0_9, %c0_10] : memref<1x32xf32, #tpu.memory_space<vmem>>, vector<1x32xf32>
    %11 = vector.broadcast %10 : vector<1x32xf32> to vector<8x32xf32>
    %12 = arith.addf %9, %11 : vector<8x32xf32>
    %c0_11 = arith.constant 0 : index
    %c0_12 = arith.constant 0 : index
    %13 = vector.load %arg1[%c0_11, %c0_12] : memref<8x4xf32, #tpu.memory_space<vmem>>, vector<8x4xf32>
    %c0_13 = arith.constant 0 : index
    %c0_14 = arith.constant 0 : index
    %14 = vector.load %arg6[%c0_13, %c0_14] : memref<4x32xf32, #tpu.memory_space<vmem>>, vector<4x32xf32>
    %cst_15 = arith.constant dense<0.000000e+00> : vector<8x32xf32>
    %15 = tpu.matmul %13, %14, %cst_15 {dimension_numbers = #tpu.dot_dimension_numbers<[1], [0], [0], [1], [0, 0, 1, 1], [], []>} : vector<8x4xf32>, vector<4x32xf32>, vector<8x32xf32> -> vector<8x32xf32>
    %c0_16 = arith.constant 0 : index
    %c0_17 = arith.constant 0 : index
    %16 = vector.load %arg7[%c0_16, %c0_17] : memref<1x32xf32, #tpu.memory_space<vmem>>, vector<1x32xf32>
    %17 = vector.broadcast %16 : vector<1x32xf32> to vector<8x32xf32>
    %18 = arith.addf %15, %17 : vector<8x32xf32>
    %cst_18 = arith.constant 0.000000e+00 : f32
    %19 = vector.broadcast %cst_18 : f32 to vector<8x32xf32>
    %20 = arith.maximumf %18, %19 : vector<8x32xf32>
    %c0_19 = arith.constant 0 : index
    %c0_20 = arith.constant 0 : index
    %21 = vector.load %arg8[%c0_19, %c0_20] : memref<32x32xf32, #tpu.memory_space<vmem>>, vector<32x32xf32>
    %cst_21 = arith.constant dense<0.000000e+00> : vector<8x32xf32>
    %22 = tpu.matmul %20, %21, %cst_21 {dimension_numbers = #tpu.dot_dimension_numbers<[1], [0], [0], [1], [0, 0, 1, 1], [], []>} : vector<8x32xf32>, vector<32x32xf32>, vector<8x32xf32> -> vector<8x32xf32>
    %c0_22 = arith.constant 0 : index
    %c0_23 = arith.constant 0 : index
    %23 = vector.load %arg9[%c0_22, %c0_23] : memref<1x32xf32, #tpu.memory_space<vmem>>, vector<1x32xf32>
    %24 = vector.broadcast %23 : vector<1x32xf32> to vector<8x32xf32>
    %25 = arith.addf %22, %24 : vector<8x32xf32>
    %26 = arith.mulf %12, %25 : vector<8x32xf32>
    %c0_24 = arith.constant 0 : index
    %c0_25 = arith.constant 0 : index
    %27 = vector.load %arg10[%c0_24, %c0_25] : memref<8x32xf32, #tpu.memory_space<vmem>>, vector<8x32xf32>
    tpu.vector_store %arg10[%c0_24, %c0_25], %26 {strides = array<i32>} : memref<8x32xf32, #tpu.memory_space<vmem>>, vector<8x32xf32>,
    return
  }
}

</mosaic_0001>

<bundles_post_ra>
// kernel: tpu_custom_call.1
= control target key start
LH: loop header
LB: loop body
LE: loop exit
PB: predicated region body
PF: predicated region fallthrough
CT: control target
= control target key end

     0   :  { %15 = vsyncpa [#allocation3], 0  ;;  %s408_s0 = inlined_call_operand.vmem [shape: f32[8,4], index: 0, kind: input, shape index: {}]   ;;  %s409_s1 = inlined_call_operand.vmem [shape: f32[8,4], index: 1, kind: input, shape index: {}]   ;;  %s410_s2 = inlined_call_operand.vmem [shape: f32[4,32], index: 2, kind: input, shape index: {}]   ;;  %s411_s3 = inlined_call_operand.vmem [shape: f32[1,32], index: 3, kind: input, shape index: {}]   ;;  %s412_s4 = inlined_call_operand.hbm [shape: f32[32,32], index: 4, kind: input, shape index: {}]   ;;  %s413_s5 = inlined_call_operand.vmem [shape: f32[1,32], index: 5, kind: input, shape index: {}]   ;;  %s414_s6 = inlined_call_operand.vmem [shape: f32[4,32], index: 6, kind: input, shape index: {}]   ;;  %s415_s7 = inlined_call_operand.vmem [shape: f32[1,32], index: 7, kind: input, shape index: {}]   ;;  %s416_s8 = inlined_call_operand.hbm [shape: f32[32,32], index: 8, kind: input, shape index: {}]   ;;  %s417_s9 = inlined_call_operand.vmem [shape: f32[1,32], index: 9, kind: input, shape index: {}]   ;;  %s418_s10 = inlined_call_operand.hbm [shape: f32[8,32], index: 10, kind: output, shape index: {}]  }
   0x1   :  { %16 = vsyncpa [#allocation6], 0 }
   0x2   :  { %17 = vsyncpa [#allocation4], 0  ;;  %s30_s15 = sshll.u32 %s412_s4, 4  ;;  %s312_s16 = smov [#allocation2]   ;;  %s31_s15 = int_to_ptr.hbm [resolvable:$true] %s30_s15 }
   0x3   :  { %s32_s17 = sshll.u32 %s312_s16, 4  ;;  %s49_s20 = sshll.u32 %s416_s8, 4  ;;  %s33_s17 = int_to_ptr.vmem [resolvable:$true] %s32_s17  ;;  %s50_s20 = int_to_ptr.hbm [resolvable:$true] %s49_s20 }
   0x4   :  { %s313_s21 = smov 128   ;;  %s314_s22 = smov 8  }
   0x5   :  { %38 = dma.hbm_to_vmem [thread:$0]  %s31_s15, 512, %s33_s17, [#allocation3], %s313_s21, %s313_s21, %s314_s22  }
   0x6   :  { %s315_s23 = smov [#allocation5]  }
   0x7   :  { %s51_s24 = sshll.u32 %s315_s23, 4  ;;  %s52_s24 = int_to_ptr.vmem [resolvable:$true] %s51_s24 }
   0x8   :  { %57 = dma.hbm_to_vmem [thread:$0]  %s50_s20, 512, %s52_s24, [#allocation6], %s313_s21, %s313_s21, %s314_s22  }
   0x9   :  { %306 = dma.done.wait [#allocation3], 512  }
   0xa   :  { %307 = vsyncadd [#allocation3], 4294966784 }
   0xb   :  { %308 = dma.done.wait [#allocation6], 512  }
   0xc   :  { %309 = vsyncadd [#allocation6], 4294966784  ;;  %vm78_vm0 = vcmask 1043456   ;;  %vm74_vm1 = vcmask 31744   ;;  %v136_v0 = vld [vmem:[%s414_s6] sm:$0xf] }
   0xd   :  { %v135_v1 = vld [vmem:[%s409_s1] sm:$0xff]  ;;  %222 = vmatpush.msk.msra.mxu2 %vm78_vm0, %v136_v0  ;;  %v171_v4 = vld [vmem:[#allocation5 + $0x18] sm:$0xff]  ;;  %v170_v5 = vld [vmem:[#allocation5 + $0x10] sm:$0xff]  ;;  %vm111_vm2 = vcmask 261120   ;;  %s208_s17 = sshll.u32 %s418_s10, 4  ;;  %s209_s17 = int_to_ptr.hbm [resolvable:$true] %s208_s17 }
   0xe   :  { %v69_v2 = vld [vmem:[%s410_s2] sm:$0xf]  ;;  %223 = vmatmul.msk.f32.vlgmr.msra.gmra.mxu2 %vm74_vm1, %v135_v1  ;;  %191 = vmatpush.msra.mxu3 %v171_v4  ;;  %v169_v6 = vld [vmem:[#allocation5 + $0x8] sm:$0xff]  ;;  %v106_v7 = vld [vmem:[#allocation2 + $0x18] sm:$0xff] }
   0xf   :  { %219 = vmatpush.msk.msra.mxu0 %vm78_vm0, %v69_v2  ;;  %v68_v3 = vld [vmem:[%s408_s0] sm:$0xff]  ;;  %127 = vmatpush.msra.mxu1 %v106_v7  ;;  %v105_v9 = vld [vmem:[#allocation2 + $0x10] sm:$0xff]  ;;  %v104_v10 = vld [vmem:[#allocation2 + $0x8] sm:$0xff] }
  0x10   :  { %220 = vmatmul.msk.f32.vlgmr.msra.gmra.mxu0 %vm74_vm1, %v68_v3  ;;  %192 = vmatpush.msra.mxu3 %v170_v5  ;;  %v168_v8 = vld [vmem:[#allocation5] sm:$0xff] }
  0x11   :  { %128 = vmatpush.msra.mxu1 %v105_v9  ;;  %v103_v11 = vld [vmem:[#allocation2] sm:$0xff] }
  0x12   :  { %193 = vmatpush.msra.mxu3 %v169_v6  ;;  %v231_v12 = vld [vmem:[%s411_s3] ss:$0 sm:$0xff] }
  0x13   :  { %129 = vmatpush.msra.mxu1 %v104_v10  ;;  %v230_v15 = vld [vmem:[%s415_s7] ss:$0 sm:$0xff]  ;;  %s316_s7 = smov [#allocation7]  }
  0x14   :  { %194 = vmatpush.msra.mxu3 %v168_v8  ;;  %v232_v20 = vld [vmem:[%s413_s5] ss:$0 sm:$0xff]  ;;  %s206_s14 = sshll.u32 %s316_s7, 4  ;;  %s207_s14 = int_to_ptr.vmem [resolvable:$true] %s206_s14 }
  0x15   :  { %130 = vmatpush.msra.mxu1 %v103_v11  ;;  %v233_v22 = vld [vmem:[%s417_s9] ss:$0 sm:$0xff] }
  0x8d   :  { %v99_v13 = vpop.f32.mrf.mxu0 }
  0x8e   :  { %v100_v14 = vadd.f32 %v231_v12, %v99_v13 }
  0x90   :  { %v102_v16 = vmax.f32 %v100_v14, 0.0 }
  0x91   :  { %v164_v17 = vpop.f32.mrf.mxu2 }
  0x92   :  { %221 = vmatmul.msk.f32.vlgmr.msra.gmra.mxu1 %vm111_vm2, %v102_v16  ;;  %v165_v18 = vadd.f32 %v230_v15, %v164_v17 }
  0x94   :  { %v167_v19 = vmax.f32 %v165_v18, 0.0 }
  0x96   :  { %224 = vmatmul.msk.f32.vlgmr.msra.gmra.mxu3 %vm111_vm2, %v167_v19 }
 0x10f   :  { %v132_v21 = vpop.f32.mrf.mxu1 }
 0x110   :  { %v133_v23 = vadd.f32 %v232_v20, %v132_v21 }
 0x119   :  { %v196_v24 = vpop.f32.mrf.mxu3 }
 0x11a   :  { %v197_v25 = vadd.f32 %v233_v22, %v196_v24 }
 0x11c   :  { %v199_v26 = vmul.f32 %v197_v25, %v133_v23 }
 0x11e   :  { %200 = vst.msk [vmem:[#allocation7] sm:$0xff] %vm111_vm2, %v199_v26 }
 0x11f   :  { %211 = dma.vmem_to_hbm [thread:$0]  %s207_s14, 128, %s209_s17, [#allocation4]  }
 0x120   :  { %310 = dma.done.wait [#allocation4], 128  }
 0x121   :  { %311 = vsyncadd [#allocation4], 4294967168 }
 0x122   :  { %216 = vsyncpa [#allocation3], 1 }
 0x123   :  { %217 = vsyncpa [#allocation6], 1 }
 0x124   :  { %218 = vsyncpa [#allocation4], 1 }

</bundles_post_ra>
